<compile_context>
chip_gen: v7x
topology: tpu7x:2x2x1
jax: 0.10.0
libtpu: 0.0.40
codegen_flags: <defaults>
</compile_context>

<pallas_src>
import math

import jax
import jax.numpy as jnp
from jax import lax
from jax.experimental import pallas as pl
from jax.experimental.pallas import tpu as pltpu

M_PLUS = 0.9
M_MINUS = 0.1
LOSS_LAMBDA = 0.5
RECON_LOSS_SCALE = 0.0005


def _round_down(x, m):
    return (x // m) * m


def _vmem_capacity_bytes():
    try:
        return int(pltpu.get_tpu_info().vmem_capacity_bytes)
    except Exception:
        return 128 * 1024 * 1024


def _make_kernel(*, block_rows, strip, lane_d, rows_total, apply_mask):
    """Build the kernel with all geometry baked in statically (no scalar prefetch needed)."""
    n_full = block_rows // strip
    rem = block_rows - n_full * strip

    def _strip_sse(img_ref, rec_ref, base_row, r0, nrows):
        x = img_ref[pl.ds(r0, nrows), :].astype(jnp.float32)
        y = rec_ref[pl.ds(r0, nrows), :].astype(jnp.float32)
        d = y - x
        if apply_mask:
            row_id = base_row + r0 + lax.broadcasted_iota(jnp.int32, (nrows, 1), 0)
            d = jnp.where(row_id < rows_total, d, 0.0)   # mask BEFORE squaring
        return d * d

    def kernel(inp_ref, lab_ref, img_ref, rec_ref, out_ref, acc_ref, margin_ref):
        c = pl.program_id(0)                 # shard (megacore split on 2-TC parts)
        i = pl.program_id(1)                 # streaming / reduction axis
        n_inner = pl.num_programs(1)
        base_row = (c * n_inner + i) * block_rows   # logical (unclamped) row offset

        # ---- per-shard init + margin loss (once, overlapped with first DMA) ----
        @pl.when(i == 0)
        def _init():
            acc_ref[...] = jnp.zeros_like(acc_ref)
            x = inp_ref[...].astype(jnp.float32)
            t = lab_ref[...].astype(jnp.float32)
            pos = jnp.maximum(M_PLUS - x, 0.0)
            neg = jnp.maximum(x - M_MINUS, 0.0)
            l_k = t * pos * pos + LOSS_LAMBDA * (1.0 - t) * neg * neg
            # margin term contributed by shard 0 only; exactly one SMEM write
            margin_ref[0] = jnp.where(c == 0, jnp.sum(l_k), 0.0).astype(jnp.float32)

        # ---- reconstruction SSE: vreg-carried strip accumulation (VPU only) ----
        if n_full > 0:
            zero = jnp.zeros((strip, lane_d), jnp.float32)
            if n_full <= 8:
                part = zero
                for r in range(n_full):
                    part = part + _strip_sse(img_ref, rec_ref, base_row, r * strip, strip)
            else:
                def body(r, carry):
                    r0 = pl.multiple_of(r * strip, strip)
                    return carry + _strip_sse(img_ref, rec_ref, base_row, r0, strip)
                part = lax.fori_loop(0, n_full, body, zero, unroll=4)
            acc_ref[...] += part
        if rem > 0:
            d2 = _strip_sse(img_ref, rec_ref, base_row, n_full * strip, rem)
            acc_ref[pl.ds(0, rem), :] = acc_ref[pl.ds(0, rem), :] + d2

        # ---- finalize: one cross-lane reduce per shard --------------------------
        @pl.when(i == n_inner - 1)
        def _fin():
            partial = margin_ref[0] + RECON_LOSS_SCALE * jnp.sum(acc_ref[...])
            out_ref[...] = jnp.broadcast_to(partial, out_ref.shape).astype(jnp.float32)

    return kernel


def capsule_loss(inputs, labels, images, reconstructions, *,
                 lane_width=1024, max_block_rows=None):
    """inputs/labels: (B, K); images/reconstructions: (B, C, H, W) any float dtype."""
    B, K = inputs.shape
    assert images.shape == reconstructions.shape
    n = math.prod(images.shape)
    itemsize = jnp.dtype(images.dtype).itemsize

    # ---- zero-copy 2-D slab (no jnp.pad / no HBM rewrite) -----------------------
    if n % lane_width == 0:
        D = lane_width                       # fully lane-dense (rows, 1024) slab
    else:
        D = n // images.shape[0]             # (B, C*H*W): last dim == full dim is legal
    rows = n // D
    img2d = images.reshape(rows, D)
    rec2d = reconstructions.reshape(rows, D)

    # ---- per-generation block sizing --------------------------------------------
    vmem_cap = _vmem_capacity_bytes()
    small_vmem = vmem_cap <= 64 * 1024 * 1024          # v7x-like (64 MiB / TC)
    row_align = max(8, 32 // itemsize)                 # 8 f32 / 16 bf16 / 32 int8
    lane_bytes = ((D + 127) // 128) * 128 * itemsize   # VMEM bytes per row (lane-padded)
    block_bytes = (4 if small_vmem else 8) * 1024 * 1024   # per-input per-step stream
    cap_rows = max(row_align, _round_down(block_bytes // lane_bytes, row_align))
    if max_block_rows is not None:
        cap_rows = max(row_align, _round_down(min(cap_rows, max_block_rows), row_align))
    block_rows = rows if rows <= cap_rows else cap_rows
    strip = min(row_align, block_rows)

    # 2-TC parts shard the HBM stream; single-TC parts use a single shard.
    num_splits = 2 if small_vmem else 1
    total_blocks = pl.cdiv(rows, block_rows)
    num_splits = min(num_splits, total_blocks)
    n_inner = pl.cdiv(total_blocks, num_splits)

    apply_mask = (rows % block_rows != 0) or (num_splits * n_inner != total_blocks)

    kernel = _make_kernel(block_rows=block_rows, strip=strip, lane_d=D,
                          rows_total=rows, apply_mask=apply_mask)

    def _stream_index(c, i):
        # Clamp the (at most one) surplus block of the last shard into bounds;
        # the kernel's row mask zeroes its contribution.
        return (jnp.minimum(c * n_inner + i, total_blocks - 1), 0)

    stream_bytes = 2 * 2 * block_rows * lane_bytes      # 2 inputs x 2 pipeline buffers
    vmem_limit = min(3 * vmem_cap // 4,
                     max(32 * 1024 * 1024, stream_bytes + 16 * 1024 * 1024))

    partials = pl.pallas_call(
        kernel,
        out_shape=jax.ShapeDtypeStruct((num_splits, 8, 128), jnp.float32),
        grid_spec=pltpu.PrefetchScalarGridSpec(
            num_scalar_prefetch=0,
            grid=(num_splits, n_inner),
            in_specs=[
                pl.BlockSpec((B, K), lambda c, i: (0, 0)),     # inputs (resident)
                pl.BlockSpec((B, K), lambda c, i: (0, 0)),     # labels (resident)
                pl.BlockSpec((block_rows, D), _stream_index),  # images stream
                pl.BlockSpec((block_rows, D), _stream_index),  # reconstructions stream
            ],
            out_specs=pl.BlockSpec((1, 8, 128), lambda c, i: (c, 0, 0)),
            scratch_shapes=[
                pltpu.VMEM((strip, D), jnp.float32),   # vreg-strip SSE accumulator
                pltpu.SMEM((1,), jnp.float32),         # margin-loss scalar
            ],
        ),
        compiler_params=pltpu.CompilerParams(
            # TODO(synk): on v7x, verify the leading axis truly core-parallelizes in the
            # Mosaic dump; if it is a serial 2x loop, switch it to pltpu.CORE_PARALLEL.
            dimension_semantics=("parallel", "arbitrary"),
            vmem_limit_bytes=int(vmem_limit),
        ),
    )(inputs, labels, img2d, rec2d)

    # Sum per-shard partials (shard 0 already carries the margin term).
    return jnp.sum(partials[:, 0, 0])


def capsule_loss_ref(inputs, labels, images, reconstructions):
    # pure-JAX reference matching the PyTorch module (size_average=False)
    img = images.reshape(images.shape[0], -1).astype(jnp.float32)
    rec = reconstructions.reshape(reconstructions.shape[0], -1).astype(jnp.float32)
    recon = jnp.sum((rec - img) ** 2)
    x = inputs.astype(jnp.float32)
    t = labels.astype(jnp.float32)
    l_k = t * jnp.maximum(M_PLUS - x, 0.0) ** 2 \
        + LOSS_LAMBDA * (1.0 - t) * jnp.maximum(x - M_MINUS, 0.0) ** 2
    margin = jnp.sum(jnp.sum(l_k, axis=1))
    return margin + RECON_LOSS_SCALE * recon


if __name__ == "__main__":
    key = jax.random.PRNGKey(0)
    k1, k2, k3, k4 = jax.random.split(key, 4)

    B, K = 2, 10          # batch, num digit capsules
    C, H, W = 4, 16, 16   # small image shape (NCHW)

    inputs = jax.random.uniform(k1, (B, K), dtype=jnp.float32)          # ||v_k|| in [0,1)
    labels = jax.nn.one_hot(jax.random.randint(k2, (B,), 0, K), K).astype(jnp.float32)
    images = jax.random.normal(k3, (B, C, H, W), dtype=jnp.float32)
    reconstructions = jax.random.normal(k4, (B, C, H, W), dtype=jnp.float32)

    out = capsule_loss(inputs, labels, images, reconstructions)
    out = jax.block_until_ready(out)
    ref = capsule_loss_ref(inputs, labels, images, reconstructions)
    assert jnp.allclose(out, ref, rtol=1e-4, atol=1e-4), (out, ref)

    # Second shape: exercises the pad-free streaming path (multi-block grid,
    # partial last block + in-kernel row mask, fori_loop strip accumulation).
    k5, k6 = jax.random.split(k4)
    images2 = jax.random.normal(k5, (2, 4, 128, 128), dtype=jnp.float32)
    recon2 = jax.random.normal(k6, (2, 4, 128, 128), dtype=jnp.float32)
    out2 = capsule_loss(inputs, labels, images2, recon2, max_block_rows=80)
    out2 = jax.block_until_ready(out2)
    ref2 = capsule_loss_ref(inputs, labels, images2, recon2)
    assert jnp.allclose(out2, ref2, rtol=5e-4, atol=1e-2), (out2, ref2)

    print("KERNEL_OK")
</pallas_src>

<mosaic_0001>
module attributes {stable_mosaic.version = 11 : i64} {
  func.func @kernel(%arg0: i32, %arg1: i32, %arg2: memref<2x10xf32, #tpu.memory_space<vmem>>, %arg3: memref<2x10xf32, #tpu.memory_space<vmem>>, %arg4: memref<2x1024xf32, #tpu.memory_space<vmem>>, %arg5: memref<2x1024xf32, #tpu.memory_space<vmem>>, %arg6: memref<1x8x128xf32, #tpu.memory_space<vmem>>, %arg7: memref<2x1024xf32, #tpu.memory_space<vmem>>, %arg8: memref<1xf32, #tpu.memory_space<smem>>) attributes {dimension_semantics = [#tpu.dimension_semantics<parallel>, #tpu.dimension_semantics<arbitrary>], iteration_bounds = array<i64: 1, 1>, scalar_prefetch = 0 : i64, scratch_operands = 2 : i64, tpu.core_type = #tpu.core_type<tc>, window_params = [{pipeline_mode = #tpu.pipeline_mode<synchronous>, transform_indices = @transform_0, window_bounds = array<i64: 2, 10>}, {pipeline_mode = #tpu.pipeline_mode<synchronous>, transform_indices = @transform_1, window_bounds = array<i64: 2, 10>}, {transform_indices = @transform_2, window_bounds = array<i64: 2, 1024>}, {transform_indices = @transform_3, window_bounds = array<i64: 2, 1024>}, {transform_indices = @transform_4, window_bounds = array<i64: 1, 8, 128>}]} {
    %c0_i32 = arith.constant 0 : i32
    %0 = arith.cmpi eq, %arg1, %c0_i32 : i32
    %1 = arith.extui %0 : i1 to i32
    %c0_i32_0 = arith.constant 0 : i32
    %2 = arith.cmpi ne, %1, %c0_i32_0 : i32
    scf.if %2 {
      %cst_10 = arith.constant 0.000000e+00 : f32
      %15 = vector.broadcast %cst_10 : f32 to vector<2x1024xf32>
      %c0_11 = arith.constant 0 : index
      %c0_12 = arith.constant 0 : index
      %16 = vector.load %arg7[%c0_11, %c0_12] : memref<2x1024xf32, #tpu.memory_space<vmem>>, vector<2x1024xf32>
      tpu.vector_store %arg7[%c0_11, %c0_12], %15 {strides = array<i32>} : memref<2x1024xf32, #tpu.memory_space<vmem>>, vector<2x1024xf32>,
      %c0_13 = arith.constant 0 : index
      %c0_14 = arith.constant 0 : index
      %17 = vector.load %arg2[%c0_13, %c0_14] : memref<2x10xf32, #tpu.memory_space<vmem>>, vector<2x10xf32>
      %c0_15 = arith.constant 0 : index
      %c0_16 = arith.constant 0 : index
      %18 = vector.load %arg3[%c0_15, %c0_16] : memref<2x10xf32, #tpu.memory_space<vmem>>, vector<2x10xf32>
      %cst_17 = arith.constant 0.899999976 : f32
      %19 = vector.broadcast %cst_17 : f32 to vector<2x10xf32>
      %20 = arith.subf %19, %17 : vector<2x10xf32>
      %cst_18 = arith.constant 0.000000e+00 : f32
      %21 = vector.broadcast %cst_18 : f32 to vector<2x10xf32>
      %22 = arith.maximumf %20, %21 : vector<2x10xf32>
      %cst_19 = arith.constant 1.000000e-01 : f32
      %23 = vector.broadcast %cst_19 : f32 to vector<2x10xf32>
      %24 = arith.subf %17, %23 : vector<2x10xf32>
      %cst_20 = arith.constant 0.000000e+00 : f32
      %25 = vector.broadcast %cst_20 : f32 to vector<2x10xf32>
      %26 = arith.maximumf %24, %25 : vector<2x10xf32>
      %27 = arith.mulf %18, %22 : vector<2x10xf32>
      %28 = arith.mulf %27, %22 : vector<2x10xf32>
      %cst_21 = arith.constant 1.000000e+00 : f32
      %29 = vector.broadcast %cst_21 : f32 to vector<2x10xf32>
      %30 = arith.subf %29, %18 : vector<2x10xf32>
      %cst_22 = arith.constant 5.000000e-01 : f32
      %31 = vector.broadcast %cst_22 : f32 to vector<2x10xf32>
      %32 = arith.mulf %31, %30 : vector<2x10xf32>
      %33 = arith.mulf %32, %26 : vector<2x10xf32>
      %34 = arith.mulf %33, %26 : vector<2x10xf32>
      %35 = arith.addf %28, %34 : vector<2x10xf32>
      %c0_i32_23 = arith.constant 0 : i32
      %36 = arith.cmpi eq, %arg0, %c0_i32_23 : i32
      %37 = vector.shape_cast %35 : vector<2x10xf32> to vector<1x2x10xf32>
      %cst_24 = arith.constant dense<0.000000e+00> : vector<1xf32>
      %38 = vector.multi_reduction <add>, %37, %cst_24 [1, 2] : vector<1x2x10xf32> to vector<1xf32>
      %39 = vector.shape_cast %38 : vector<1xf32> to vector<1x1x1xf32>
      %40 = vector.extract %39[0, 0, 0] : f32 from vector<1x1x1xf32>
      %cst_25 = arith.constant 0.000000e+00 : f32
      %41 = arith.select %36, %40, %cst_25 : f32
      %c0_26 = arith.constant 0 : index
      %42 = memref.load %arg8[%c0_26] : memref<1xf32, #tpu.memory_space<smem>>
      memref.store %41, %arg8[%c0_26] : memref<1xf32, #tpu.memory_space<smem>>
    } else {
    }
    %cst = arith.constant 0.000000e+00 : f32
    %3 = vector.broadcast %cst : f32 to vector<2x1024xf32>
    %c0 = arith.constant 0 : index
    %c0_1 = arith.constant 0 : index
    %4 = vector.load %arg4[%c0, %c0_1] : memref<2x1024xf32, #tpu.memory_space<vmem>>, vector<2x1024xf32>
    %c0_2 = arith.constant 0 : index
    %c0_3 = arith.constant 0 : index
    %5 = vector.load %arg5[%c0_2, %c0_3] : memref<2x1024xf32, #tpu.memory_space<vmem>>, vector<2x1024xf32>
    %6 = arith.subf %5, %4 : vector<2x1024xf32>
    %7 = arith.mulf %6, %6 : vector<2x1024xf32>
    %8 = arith.addf %3, %7 : vector<2x1024xf32>
    %c0_4 = arith.constant 0 : index
    %c0_5 = arith.constant 0 : index
    %9 = vector.load %arg7[%c0_4, %c0_5] : memref<2x1024xf32, #tpu.memory_space<vmem>>, vector<2x1024xf32>
    %10 = arith.addf %9, %8 : vector<2x1024xf32>
    %c0_6 = arith.constant 0 : index
    %c0_7 = arith.constant 0 : index
    %11 = vector.load %arg7[%c0_6, %c0_7] : memref<2x1024xf32, #tpu.memory_space<vmem>>, vector<2x1024xf32>
    tpu.vector_store %arg7[%c0_6, %c0_7], %10 {strides = array<i32>} : memref<2x1024xf32, #tpu.memory_space<vmem>>, vector<2x1024xf32>,
    %c0_i32_8 = arith.constant 0 : i32
    %12 = arith.cmpi eq, %arg1, %c0_i32_8 : i32
    %13 = arith.extui %12 : i1 to i32
    %c0_i32_9 = arith.constant 0 : i32
    %14 = arith.cmpi ne, %13, %c0_i32_9 : i32
    scf.if %14 {
      %c0_10 = arith.constant 0 : index
      %15 = memref.load %arg8[%c0_10] : memref<1xf32, #tpu.memory_space<smem>>
      %c0_11 = arith.constant 0 : index
      %c0_12 = arith.constant 0 : index
      %16 = vector.load %arg7[%c0_11, %c0_12] : memref<2x1024xf32, #tpu.memory_space<vmem>>, vector<2x1024xf32>
      %17 = vector.shape_cast %16 : vector<2x1024xf32> to vector<1x2x1024xf32>
      %cst_13 = arith.constant dense<0.000000e+00> : vector<1xf32>
      %18 = vector.multi_reduction <add>, %17, %cst_13 [1, 2] : vector<1x2x1024xf32> to vector<1xf32>
      %19 = vector.shape_cast %18 : vector<1xf32> to vector<1x1x1xf32>
      %20 = vector.extract %19[0, 0, 0] : f32 from vector<1x1x1xf32>
      %cst_14 = arith.constant 5.000000e-04 : f32
      %21 = arith.mulf %cst_14, %20 : f32
      %22 = arith.addf %15, %21 : f32
      %23 = vector.broadcast %22 : f32 to vector<1x8x128xf32>
      %c0_15 = arith.constant 0 : index
      %c0_16 = arith.constant 0 : index
      %c0_17 = arith.constant 0 : index
      %24 = vector.load %arg6[%c0_15, %c0_16, %c0_17] : memref<1x8x128xf32, #tpu.memory_space<vmem>>, vector<1x8x128xf32>
      tpu.vector_store %arg6[%c0_15, %c0_16, %c0_17], %23 {strides = array<i32>} : memref<1x8x128xf32, #tpu.memory_space<vmem>>, vector<1x8x128xf32>,
    } else {
    }
    return
  }
  func.func @transform_0(%arg0: i32, %arg1: i32) -> (i32, i32) {
    %c0_i32 = arith.constant 0 : i32
    %c0_i32_0 = arith.constant 0 : i32
    %c0_i32_1 = arith.constant 0 : i32
    return %c0_i32, %c0_i32_0 : i32, i32
  }
  func.func @transform_1(%arg0: i32, %arg1: i32) -> (i32, i32) {
    %c0_i32 = arith.constant 0 : i32
    %c0_i32_0 = arith.constant 0 : i32
    %c0_i32_1 = arith.constant 0 : i32
    return %c0_i32, %c0_i32_0 : i32, i32
  }
  func.func @transform_2(%arg0: i32, %arg1: i32) -> (i32, i32) {
    %c1_i32 = arith.constant 1 : i32
    %0 = arith.muli %arg0, %c1_i32 : i32
    %1 = arith.addi %0, %arg1 : i32
    %c0_i32 = arith.constant 0 : i32
    %2 = arith.minsi %1, %c0_i32 : i32
    %c0_i32_0 = arith.constant 0 : i32
    %c0_i32_1 = arith.constant 0 : i32
    return %2, %c0_i32_0 : i32, i32
  }
  func.func @transform_3(%arg0: i32, %arg1: i32) -> (i32, i32) {
    %c1_i32 = arith.constant 1 : i32
    %0 = arith.muli %arg0, %c1_i32 : i32
    %1 = arith.addi %0, %arg1 : i32
    %c0_i32 = arith.constant 0 : i32
    %2 = arith.minsi %1, %c0_i32 : i32
    %c0_i32_0 = arith.constant 0 : i32
    %c0_i32_1 = arith.constant 0 : i32
    return %2, %c0_i32_0 : i32, i32
  }
  func.func @transform_4(%arg0: i32, %arg1: i32) -> (i32, i32, i32) {
    %c0_i32 = arith.constant 0 : i32
    %c0_i32_0 = arith.constant 0 : i32
    %c0_i32_1 = arith.constant 0 : i32
    return %arg0, %c0_i32, %c0_i32_0 : i32, i32, i32
  }
}

</mosaic_0001>

<bundles_post_ra>
// kernel: tpu_custom_call.1
= control target key start
LH: loop header
LB: loop body
LE: loop exit
PB: predicated region body
PF: predicated region fallthrough
CT: control target
= control target key end

     0   :  { %9 = vsyncpa [#allocation5], 0  ;;  %s413_s0 = inlined_call_operand.hbm [shape: f32[2,10], index: 0, kind: input, shape index: {}]   ;;  %s414_s1 = inlined_call_operand.vmem [shape: f32[2,10], index: 1, kind: input, shape index: {}]   ;;  %s415_s2 = inlined_call_operand.hbm [shape: f32[2,1024], index: 2, kind: input, shape index: {}]   ;;  %s416_s3 = inlined_call_operand.hbm [shape: f32[2,1024], index: 3, kind: input, shape index: {}]   ;;  %s417_s4 = inlined_call_operand.hbm [shape: f32[1,8,128], index: 4, kind: output, shape index: {}]  }
   0x1   :  { %10 = vsyncpa [#allocation8], 0 }
   0x2   :  { %11 = vsyncpa [#allocation6], 0  ;;  %s324_s15 = smov [#allocation7]   ;;  %s325_s17 = smov [#allocation4]  }
   0x3   :  { %s36_s16 = sshll.u32 %s324_s15, 4  ;;  %s18_s18 = sshll.u32 %s325_s17, 4  ;;  %s37_s16 = int_to_ptr.vmem [resolvable:$true] %s36_s16  ;;  %s19_s18 = int_to_ptr.vmem [resolvable:$true] %s18_s18 }
   0x4   :  { %s230_s21 = scalar_lea.hbm %s415_s2, 256 }
   0x5   :  { %p231_p0 = scmp.ne.s32.totalorder %s415_s2, %s230_s21  ;;  %p234_p1 = scmp.lt.u32.totalorder %s230_s21, %s415_s2 }
   0x7   :  { %p236_p2 = pnand %p234_p1, %p231_p0 }
   0x9   :  { %239 = shalt.err (!%p236_p2)
}
   0xa   :  { %s240_s26 = scalar_lea.vmem %s37_s16, 256  ;;  %p245_p4 = scmp.lt.s32.totalorder %s37_s16, %s37_s16 }
   0xb   :  { %p241_p3 = scmp.ne.s32.totalorder %s37_s16, %s240_s26  ;;  %p246_p5 = scmp.lt.s32.totalorder %s240_s26, %s240_s26 }
   0xd   :  { %p247_p6 = por %p246_p5, %p245_p4 }
   0xf   :  { %p248_p7 = pnand %p247_p6, %p241_p3 }
  0x11   :  { %251 = shalt.err (!%p248_p7)
}
  0x12   :  { %39 = dma.hbm_to_vmem [thread:$0]  %s415_s2, 256, %s37_s16, [#allocation8]  }
  0x13   :  { %s252_s5 = scalar_lea.hbm %s413_s0, 32 }
  0x14   :  { %p253_p8 = scmp.ne.s32.totalorder %s413_s0, %s252_s5  ;;  %p256_p9 = scmp.lt.u32.totalorder %s252_s5, %s413_s0 }
  0x16   :  { %p258_p10 = pnand %p256_p9, %p253_p8 }
  0x18   :  { %261 = shalt.err (!%p258_p10)
}
  0x19   :  { %s262_s10 = scalar_lea.vmem %s19_s18, 32  ;;  %p267_p12 = scmp.lt.s32.totalorder %s19_s18, %s19_s18 }
  0x1a   :  { %p263_p11 = scmp.ne.s32.totalorder %s19_s18, %s262_s10  ;;  %p268_p13 = scmp.lt.s32.totalorder %s262_s10, %s262_s10 }
  0x1c   :  { %p269_p0 = por %p268_p13, %p267_p12 }
  0x1e   :  { %p270_p1 = pnand %p269_p0, %p263_p11 }
  0x20   :  { %273 = shalt.err (!%p270_p1)
}
  0x21   :  { %21 = dma.hbm_to_vmem [thread:$0]  %s413_s0, 32, %s19_s18, [#allocation5]  }
  0x22   :  { %s326_s12 = smov [#allocation9]   ;;  %s274_s16 = scalar_lea.hbm %s416_s3, 256 }
  0x23   :  { %s52_s13 = sshll.u32 %s326_s12, 4  ;;  %p275_p2 = scmp.ne.s32.totalorder %s416_s3, %s274_s16  ;;  %s53_s13 = int_to_ptr.vmem [resolvable:$true] %s52_s13 }
  0x24   :  { %p278_p3 = scmp.lt.u32.totalorder %s274_s16, %s416_s3 }
  0x26   :  { %p280_p4 = pnand %p278_p3, %p275_p2 }
  0x28   :  { %283 = shalt.err (!%p280_p4)
}
  0x29   :  { %s284_s22 = scalar_lea.vmem %s53_s13, 256  ;;  %p289_p6 = scmp.lt.s32.totalorder %s53_s13, %s53_s13 }
  0x2a   :  { %p285_p5 = scmp.ne.s32.totalorder %s53_s13, %s284_s22  ;;  %p290_p7 = scmp.lt.s32.totalorder %s284_s22, %s284_s22 }
  0x2c   :  { %p291_p8 = por %p290_p7, %p289_p6 }
  0x2e   :  { %p292_p9 = pnand %p291_p8, %p285_p5 }
  0x30   :  { %295 = shalt.err (!%p292_p9)
}
  0x31   :  { %55 = dma.hbm_to_vmem [thread:$0]  %s416_s3, 256, %s53_s13, [#allocation8]  }
  0x32   :  { %318 = dma.done.wait [#allocation5], 32  }
  0x33   :  { %319 = vsyncadd [#allocation5], 4294967264 }
  0x34   :  { %320 = dma.done.wait [#allocation8], 512  }
  0x35   :  { %321 = vsyncadd [#allocation8], 4294966784  ;;  %v327_v0 = vmov 1983009808   ;;  %v133_v2 = vlaneseq  ;;  %v77_v5 = vld [vmem:[#allocation4] sm:$0x3] }
  0x36   :  { %v131_v1 = vunpack.c.l.s4 %v327_v0  ;;  %v78_v6 = vld [vmem:[%s414_s1] sm:$0x3]  ;;  %v105_v7 = vld [vmem:[#allocation7] sm:$0xff]  ;;  %v79_v8 = vsub.f32 0.9, %v77_v5  ;;  %v106_v11 = vld [vmem:[#allocation7 + $0x8] sm:$0xff] }
  0x37   :  { %v134_v4 = vshrl.u32 %v133_v2, 7  ;;  %v220_v9 = vadd.f32 -0.1, %v77_v5  ;;  %v85_v10 = vsub.f32 1.0, %v78_v6  ;;  %v107_v12 = vld [vmem:[#allocation9] sm:$0xff]  ;;  %v108_v13 = vld [vmem:[#allocation9 + $0x8] sm:$0xff] }
  0x38   :  { %v132_v3 = vunpack.c.0.s8 %v131_v1  ;;  %v80_v15 = vmax.f32 %v79_v8, 0.0  ;;  %v109_v18 = vsub.f32 %v107_v12, %v105_v7  ;;  %v110_v19 = vsub.f32 %v108_v13, %v106_v11  ;;  %s328_s26 = smov [#allocation10]  }
  0x39   :  { %v82_v16 = vmax.f32 %v220_v9, 0.0  ;;  %v86_v17 = vmul.f32 0.5, %v85_v10  ;;  %vm171_vm0 = vcmask 1041408   ;;  %vm91_vm1 = vcmask 74752   ;;  %s206_s27 = sshll.u32 %s328_s26, 4  ;;  %s207_s27 = int_to_ptr.vmem [resolvable:$true] %s206_s27 }
  0x3a   :  { %v135_v14 = vsub.s32 %v132_v3, %v134_v4  ;;  %v83_v20 = vmul.f32 %v80_v15, %v78_v6  ;;  %v111_v22 = vmul.f32 %v109_v18, %v109_v18  ;;  %v112_v23 = vmul.f32 %v110_v19, %v110_v19  ;;  %s296_s29 = scalar_lea.vmem %s207_s27, 128  ;;  %p301_p11 = scmp.lt.s32.totalorder %s207_s27, %s207_s27 }
  0x3b   :  { %v87_v21 = vmul.f32 %v86_v17, %v82_v16  ;;  %p297_p10 = scmp.ne.s32.totalorder %s207_s27, %s296_s29  ;;  %p302_p12 = scmp.lt.s32.totalorder %s296_s29, %s296_s29 }
  0x3c   :  { %v84_v24 = vmul.f32 %v83_v20, %v80_v15  ;;  %v129_v26 = vcombine.high %v111_v22, %v111_v22  ;;  %v136_v27 = vrot.slane %v111_v22, %v135_v14  ;;  %v146_v28 = vcombine.high %v112_v23, %v112_v23 }
  0x3d   :  { %v88_v25 = vmul.f32 %v87_v21, %v82_v16  ;;  %v153_v29 = vrot.slane %v112_v23, %v135_v14  ;;  %p303_p13 = por %p302_p12, %p301_p11 }
  0x3e   :  { %v143_v31 = vrot.slane %v129_v26, %v135_v14  ;;  %v144_v32 = vcombine.high %v136_v27, %v136_v27  ;;  %v172_v33 = vsel %vm171_vm0, %v136_v27, 0.0  ;;  %v160_v39 = vrot.slane %v146_v28, %v135_v14 }
  0x3f   :  { %v89_v30 = vadd.f32 %v88_v25, %v84_v24  ;;  %v161_v40 = vcombine.high %v153_v29, %v153_v29  ;;  %v179_v43 = vsel %vm171_vm0, %v153_v29, 0.0  ;;  %p304_p0 = pnand %p303_p13, %p297_p10 }
  0x40   :  { %v145_v35 = vcombine.high %v143_v31, %v143_v31  ;;  %v173_v36 = vsel %vm171_vm0, %v144_v32, 0.0  ;;  %v175_v37 = vsel %vm171_vm0, %v143_v31, 0.0  ;;  %v162_v45 = vcombine.high %v160_v39, %v160_v39 }
  0x41   :  { %v92_v34 = vsel %vm91_vm1, %v89_v30, 0.0  ;;  %v174_v38 = vadd.f32 %v173_v36, %v172_v33  ;;  %v181_v46 = vsel %vm171_vm0, %v161_v40, 0.0  ;;  %v183_v48 = vsel %vm171_vm0, %v160_v39, 0.0 }
  0x42   :  { %93 = vadd.xlane.f32.xlu0 %v92_v34  ;;  %v177_v41 = vsel %vm171_vm0, %v145_v35, 0.0  ;;  %v185_v50 = vsel %vm171_vm0, %v162_v45, 0.0 }
  0x43   :  { %v176_v42 = vadd.f32 %v175_v37, %v174_v38 }
  0x45   :  { %v178_v44 = vadd.f32 %v177_v41, %v176_v42 }
  0x47   :  { %v180_v47 = vadd.f32 %v179_v43, %v178_v44 }
  0x49   :  { %v182_v49 = vadd.f32 %v181_v46, %v180_v47 }
  0x4b   :  { %v184_v51 = vadd.f32 %v183_v48, %v182_v49 }
  0x4d   :  { %v186_v52 = vadd.f32 %v185_v50, %v184_v51 }
  0x4f   :  { %187 = vadd.xlane.f32.xlu0 %v186_v52 }
  0xcf   :  { %v94_v53 = vpop.xlane.xlu0 %93 }
  0xd0   :  { %v95_v54 = vrot.slane %v94_v53, 4 }
  0xd2   :  { %v96_v55 = vadd.f32 %v95_v54, %v94_v53 }
  0xd4   :  { %v97_v56 = vrot.slane %v96_v55, 2 }
  0xd6   :  { %v98_v57 = vadd.f32 %v97_v56, %v96_v55 }
  0xd8   :  { %v99_v58 = vrot.slane %v98_v57, 1 }
  0xda   :  { %v100_v59 = vadd.f32 %v99_v58, %v98_v57 }
  0xdc   :  { %221 = vpush %v100_v59  ;;  %v188_v60 = vpop.xlane.xlu0 %187 }
  0xdd   :  { %v189_v61 = vrot.slane %v188_v60, 4 }
  0xdf   :  { %v190_v62 = vadd.f32 %v189_v61, %v188_v60 }
  0xe1   :  { %v191_v63 = vrot.slane %v190_v62, 2 }
  0xe3   :  { %v192_v0 = vadd.f32 %v191_v63, %v190_v62 }
  0xe5   :  { %v193_v1 = vrot.slane %v192_v0, 1 }
  0xe7   :  { %v194_v2 = vadd.f32 %v193_v1, %v192_v0 }
  0xe9   :  { %223 = vpush %v194_v2 }
 0x10d   :  { %s222_s1 = spop %221 }
 0x11a   :  { %s224_s3 = spop %223 }
 0x11b   :  { %s196_s25 = smul.f32 0.0005, %s224_s3 }
 0x11d   :  { %s197_s28 = sadd.f32 %s222_s1, %s196_s25 }
 0x11f   :  { %v198_v3 = vstv %s197_s28 }
 0x120   :  { %199 = vst [vmem:[#allocation10] sm:$0xff] %v198_v3 }
 0x121   :  { %307 = shalt.err (!%p304_p0)
}
 0x122   :  { %s308_s6 = scalar_lea.hbm %s417_s4, 128 }
 0x123   :  { %p309_p1 = scmp.ne.s32.totalorder %s417_s4, %s308_s6  ;;  %p312_p2 = scmp.lt.u32.totalorder %s308_s6, %s417_s4 }
 0x125   :  { %p314_p3 = pnand %p312_p2, %p309_p1 }
 0x127   :  { %317 = shalt.err (!%p314_p3)
}
 0x128   :  { %209 = dma.vmem_to_hbm [thread:$0]  %s207_s27, 128, %s417_s4, [#allocation6]  }
 0x129   :  { %322 = dma.done.wait [#allocation6], 128  }
 0x12a   :  { %323 = vsyncadd [#allocation6], 4294967168 }
 0x12b   :  { %213 = vsyncpa [#allocation5], 1 }
 0x12c   :  { %214 = vsyncpa [#allocation8], 1 }
 0x12d   :  { %215 = vsyncpa [#allocation6], 1 }

</bundles_post_ra>
